<compile_context>
chip_gen: v7x
topology: tpu7x:2x2x1
jax: 0.10.0
libtpu: 0.0.40
codegen_flags: <defaults>
</compile_context>

<pallas_src>
import jax
import jax.numpy as jnp
from jax.experimental import pallas as pl
from jax.experimental.pallas import tpu as pltpu


# ---------------------------------------------------------------------------
# Pallas kernels
# ---------------------------------------------------------------------------
def _conv_pool_kernel(p_ref, w_ref, b_ref, o_ref):
    """Fused conv (as matmul) + bias + ReLU + 2x2 max-pool.

    p_ref: (Cin*R*R, TM)    bf16  -- shared stride-2 RxR im2col slab (R=6)
    w_ref: (4, Cout, Cin*R*R) bf16 -- zero-embedded tap weights, one per pool tap
    b_ref: (Cout, 1)        f32
    o_ref: (Cout, TM)       bf16  -- lane-dense pooled output columns
    """
    p = p_ref[...]
    acc = jnp.maximum(
        jnp.maximum(jnp.dot(w_ref[0], p, preferred_element_type=jnp.float32),
                    jnp.dot(w_ref[1], p, preferred_element_type=jnp.float32)),
        jnp.maximum(jnp.dot(w_ref[2], p, preferred_element_type=jnp.float32),
                    jnp.dot(w_ref[3], p, preferred_element_type=jnp.float32)),
    )
    # bias-add + ReLU are monotone, so applying them after the 4-tap max is
    # exactly max(relu(conv + b)) -- all epilogue math kept in f32 (VPU).
    o_ref[...] = jnp.maximum(acc + b_ref[...], 0.0).astype(o_ref.dtype)


def _fc_chain_kernel(x_ref, w1_ref, b1_ref, w2_ref, b2_ref, w3_ref, b3_ref,
                     o_ref):
    """fc1+ReLU -> fc2+ReLU -> fc3 fused; intermediates never leave VMEM."""
    h = jnp.dot(x_ref[...], w1_ref[...], preferred_element_type=jnp.float32)
    h = jnp.maximum(h + b1_ref[...], 0.0)
    h = jnp.dot(h.astype(w2_ref.dtype), w2_ref[...],
                preferred_element_type=jnp.float32)
    h = jnp.maximum(h + b2_ref[...], 0.0)
    h = jnp.dot(h.astype(w3_ref.dtype), w3_ref[...],
                preferred_element_type=jnp.float32)
    o_ref[...] = (h + b3_ref[...]).astype(o_ref.dtype)


# ---------------------------------------------------------------------------
# Wrappers
# ---------------------------------------------------------------------------
def _pick_tile(dim, target, align):
    """Largest tile <= target that is a multiple of `align` and divides `dim`
    (falls back to `dim` when small, else to `target` with a ragged tail)."""
    if dim <= target:
        return dim
    for t in range(target, align - 1, -align):
        if dim % t == 0:
            return t
    return target


def _pool_patches(x, K, R):
    """x: (Cin, N, H, W) -> (Cin*R*R, N*Hp*Wp) stride-2 RxR im2col slab.

    Entry ((c, rh, rw), (n, hp, wp)) = x[c, n, 2*hp+rh, 2*wp+rw]; the single
    slab covers all 4 pool taps (tap (dh,dw), kernel (kh,kw) -> rh=dh+kh,
    rw=dw+kw), with R = K + 1.  Row order (c, rh, rw) matches the tap-weight
    embedding in preprocess_params.
    """
    C, N, H, W = x.shape
    Hp, Wp = (H - K + 1) // 2, (W - K + 1) // 2
    sl = [
        x[:, :, rh: rh + 2 * Hp - 1: 2, rw: rw + 2 * Wp - 1: 2]
        for rh in range(R) for rw in range(R)
    ]                                            # each (C, N, Hp, Wp)
    p = jnp.stack(sl, axis=1)                    # (C, R*R, N, Hp, Wp)
    return p.reshape(C * R * R, N * Hp * Wp), Hp, Wp


def conv_relu_pool(x, w_taps, b, *, K=5, R=6, tile_m=2048):
    """x: (Cin, N, H, W) bf16; w_taps: (4, Cout, Cin*R*R) bf16; b: (Cout,1) f32.
    Returns the pooled activation (Cout, N*Hp*Wp) bf16 (lane-dense columns)."""
    _, Cout, CRR = w_taps.shape
    # TODO(synk): the stride-2 im2col above still expands the activation ~7x in
    # HBM; folding the window gather fully into the kernel (strided VMEM reads)
    # is the remaining HBM-traffic optimization.
    patches, Hp, Wp = _pool_patches(x, K, R)
    M = patches.shape[-1]
    TM = _pick_tile(M, tile_m, 128)
    out = pl.pallas_call(
        _conv_pool_kernel,
        out_shape=jax.ShapeDtypeStruct((Cout, M), jnp.bfloat16),
        grid=(pl.cdiv(M, TM),),
        in_specs=[
            pl.BlockSpec((CRR, TM), lambda i: (0, i)),       # patches: M-tiled
            pl.BlockSpec((4, Cout, CRR), lambda i: (0, 0, 0)),  # weights: resident
            pl.BlockSpec((Cout, 1), lambda i: (0, 0)),       # bias:    resident
        ],
        out_specs=pl.BlockSpec((Cout, TM), lambda i: (0, i)),
        compiler_params=pltpu.CompilerParams(
            dimension_semantics=("parallel",)),
    )(patches, w_taps, b)
    return out, Hp, Wp


def fc_chain(x, p, *, tile_rows=1024):
    """x: (N, 400) bf16 -> logits (N, 10) f32; fc1/fc2/fc3 in one kernel."""
    N, F = x.shape
    TB = _pick_tile(N, tile_rows, 8)
    return pl.pallas_call(
        _fc_chain_kernel,
        out_shape=jax.ShapeDtypeStruct((N, 10), jnp.float32),
        grid=(pl.cdiv(N, TB),),
        in_specs=[
            pl.BlockSpec((TB, F), lambda i: (i, 0)),
            pl.BlockSpec((400, 120), lambda i: (0, 0)),
            pl.BlockSpec((1, 120), lambda i: (0, 0)),
            pl.BlockSpec((120, 84), lambda i: (0, 0)),
            pl.BlockSpec((1, 84), lambda i: (0, 0)),
            pl.BlockSpec((84, 10), lambda i: (0, 0)),
            pl.BlockSpec((1, 10), lambda i: (0, 0)),
        ],
        out_specs=pl.BlockSpec((TB, 10), lambda i: (i, 0)),
        compiler_params=pltpu.CompilerParams(
            dimension_semantics=("parallel",)),
    )(x.astype(jnp.bfloat16),
      p["fc1_w"], p["fc1_b"], p["fc2_w"], p["fc2_b"], p["fc3_w"], p["fc3_b"])


# ---------------------------------------------------------------------------
# Parameters (shapes match the nn.Module) and one-time repacking
# ---------------------------------------------------------------------------
def init_params(key):
    def uniform(k, shape, fan_in):
        bound = 1.0 / jnp.sqrt(jnp.float32(fan_in))
        return jax.random.uniform(k, shape, jnp.float32, -bound, bound)

    ks = jax.random.split(key, 10)
    return {
        "conv1_w": uniform(ks[0], (6, 3, 5, 5), 3 * 5 * 5),
        "conv1_b": uniform(ks[1], (6,), 3 * 5 * 5),
        "conv2_w": uniform(ks[2], (16, 6, 5, 5), 6 * 5 * 5),
        "conv2_b": uniform(ks[3], (16,), 6 * 5 * 5),
        "fc1_w": uniform(ks[4], (120, 400), 400),
        "fc1_b": uniform(ks[5], (120,), 400),
        "fc2_w": uniform(ks[6], (84, 120), 120),
        "fc2_b": uniform(ks[7], (84,), 120),
        "fc3_w": uniform(ks[8], (10, 84), 84),
        "fc3_b": uniform(ks[9], (10,), 84),
    }


def _embed_tap_weights(w, R=6):
    """w: (Cout, Cin, K, K) f32 -> (4, Cout, Cin*R*R) bf16 zero-embedded tap
    weights: tap (dh, dw) places W[o, c, kh, kw] at column (c, dh+kh, dw+kw)."""
    Cout, Cin, K, _ = w.shape
    taps = []
    for dh in range(2):
        for dw in range(2):
            wt = jnp.zeros((Cout, Cin, R, R), w.dtype)
            wt = wt.at[:, :, dh:dh + K, dw:dw + K].set(w)
            taps.append(wt.reshape(Cout, Cin * R * R))
    return jnp.stack(taps, axis=0).astype(jnp.bfloat16)


def preprocess_params(p):
    """One-time repack: conv weights -> zero-embedded (4, Cout, Cin*36) bf16 tap
    weights, fc weights -> transposed bf16, biases -> broadcast-ready f32."""
    return {
        "conv1_w": _embed_tap_weights(p["conv1_w"]),
        "conv1_b": p["conv1_b"].reshape(6, 1).astype(jnp.float32),
        "conv2_w": _embed_tap_weights(p["conv2_w"]),
        "conv2_b": p["conv2_b"].reshape(16, 1).astype(jnp.float32),
        "fc1_w": p["fc1_w"].T.astype(jnp.bfloat16),
        "fc1_b": p["fc1_b"].reshape(1, 120).astype(jnp.float32),
        "fc2_w": p["fc2_w"].T.astype(jnp.bfloat16),
        "fc2_b": p["fc2_b"].reshape(1, 84).astype(jnp.float32),
        "fc3_w": p["fc3_w"].T.astype(jnp.bfloat16),
        "fc3_b": p["fc3_b"].reshape(1, 10).astype(jnp.float32),
    }


# ---------------------------------------------------------------------------
# Forward pass (semantics of Net.forward)
# ---------------------------------------------------------------------------
@jax.jit
def net_forward(x, params):
    # x: (N, 3, 32, 32) NCHW f32 -> one small transpose to channel-major
    # (C, N, H, W) + bf16 cast at the kernel boundary.
    N = x.shape[0]
    h = jnp.transpose(x, (1, 0, 2, 3)).astype(jnp.bfloat16)        # (3, N, 32, 32)
    h, Hp, Wp = conv_relu_pool(h, params["conv1_w"], params["conv1_b"], K=5)
    h = h.reshape(6, N, Hp, Wp)                                    # (6, N, 14, 14)
    h, Hp, Wp = conv_relu_pool(h, params["conv2_w"], params["conv2_b"], K=5)
    # (16, N*5*5) -> (N, 16*5*5) in torch's (c, h, w) flatten order.
    h = h.reshape(16, N, Hp * Wp).transpose(1, 0, 2).reshape(N, 16 * Hp * Wp)
    return fc_chain(h, params)                                     # (N, 10) f32


if __name__ == "__main__":
    key = jax.random.PRNGKey(0)
    k_in, k_par = jax.random.split(key)
    x = jax.random.normal(k_in, (2, 3, 32, 32), dtype=jnp.float32)
    params = preprocess_params(init_params(k_par))

    out = net_forward(x, params)
    out = jax.block_until_ready(out)
    assert out.shape == (2, 10) and out.dtype == jnp.float32
    print("KERNEL_OK")
</pallas_src>

<mosaic_0001>
module attributes {stable_mosaic.version = 11 : i64} {
  func.func @_conv_pool_kernel(%arg0: i32, %arg1: memref<108x392xbf16, #tpu.memory_space<vmem>>, %arg2: memref<4x6x108xbf16, #tpu.memory_space<vmem>>, %arg3: memref<6x1xf32, #tpu.memory_space<vmem>>, %arg4: memref<6x392xbf16, #tpu.memory_space<vmem>>) attributes {dimension_semantics = [#tpu.dimension_semantics<parallel>], iteration_bounds = array<i64: 1>, scalar_prefetch = 0 : i64, scratch_operands = 0 : i64, tpu.core_type = #tpu.core_type<tc>, window_params = [{transform_indices = @transform_0, window_bounds = array<i64: 108, 392>}, {pipeline_mode = #tpu.pipeline_mode<synchronous>, transform_indices = @transform_1, window_bounds = array<i64: 4, 6, 108>}, {pipeline_mode = #tpu.pipeline_mode<synchronous>, transform_indices = @transform_2, window_bounds = array<i64: 6, 1>}, {transform_indices = @transform_3, window_bounds = array<i64: 6, 392>}]} {
    %c0 = arith.constant 0 : index
    %c0_0 = arith.constant 0 : index
    %0 = vector.load %arg1[%c0, %c0_0] : memref<108x392xbf16, #tpu.memory_space<vmem>>, vector<108x392xbf16>
    %c0_1 = arith.constant 0 : index
    %c0_2 = arith.constant 0 : index
    %c0_3 = arith.constant 0 : index
    %1 = vector.load %arg2[%c0_1, %c0_2, %c0_3] : memref<4x6x108xbf16, #tpu.memory_space<vmem>>, vector<1x6x108xbf16>
    %2 = vector.shape_cast %1 : vector<1x6x108xbf16> to vector<6x108xbf16>
    %cst = arith.constant dense<0.000000e+00> : vector<6x392xf32>
    %3 = tpu.matmul %2, %0, %cst {dimension_numbers = #tpu.dot_dimension_numbers<[1], [0], [0], [1], [0, 0, 1, 1], [], []>} : vector<6x108xbf16>, vector<108x392xbf16>, vector<6x392xf32> -> vector<6x392xf32>
    %c1 = arith.constant 1 : index
    %c0_4 = arith.constant 0 : index
    %c0_5 = arith.constant 0 : index
    %4 = vector.load %arg2[%c1, %c0_4, %c0_5] : memref<4x6x108xbf16, #tpu.memory_space<vmem>>, vector<1x6x108xbf16>
    %5 = vector.shape_cast %4 : vector<1x6x108xbf16> to vector<6x108xbf16>
    %cst_6 = arith.constant dense<0.000000e+00> : vector<6x392xf32>
    %6 = tpu.matmul %5, %0, %cst_6 {dimension_numbers = #tpu.dot_dimension_numbers<[1], [0], [0], [1], [0, 0, 1, 1], [], []>} : vector<6x108xbf16>, vector<108x392xbf16>, vector<6x392xf32> -> vector<6x392xf32>
    %7 = arith.maximumf %3, %6 : vector<6x392xf32>
    %c2 = arith.constant 2 : index
    %c0_7 = arith.constant 0 : index
    %c0_8 = arith.constant 0 : index
    %8 = vector.load %arg2[%c2, %c0_7, %c0_8] : memref<4x6x108xbf16, #tpu.memory_space<vmem>>, vector<1x6x108xbf16>
    %9 = vector.shape_cast %8 : vector<1x6x108xbf16> to vector<6x108xbf16>
    %cst_9 = arith.constant dense<0.000000e+00> : vector<6x392xf32>
    %10 = tpu.matmul %9, %0, %cst_9 {dimension_numbers = #tpu.dot_dimension_numbers<[1], [0], [0], [1], [0, 0, 1, 1], [], []>} : vector<6x108xbf16>, vector<108x392xbf16>, vector<6x392xf32> -> vector<6x392xf32>
    %c3 = arith.constant 3 : index
    %c0_10 = arith.constant 0 : index
    %c0_11 = arith.constant 0 : index
    %11 = vector.load %arg2[%c3, %c0_10, %c0_11] : memref<4x6x108xbf16, #tpu.memory_space<vmem>>, vector<1x6x108xbf16>
    %12 = vector.shape_cast %11 : vector<1x6x108xbf16> to vector<6x108xbf16>
    %cst_12 = arith.constant dense<0.000000e+00> : vector<6x392xf32>
    %13 = tpu.matmul %12, %0, %cst_12 {dimension_numbers = #tpu.dot_dimension_numbers<[1], [0], [0], [1], [0, 0, 1, 1], [], []>} : vector<6x108xbf16>, vector<108x392xbf16>, vector<6x392xf32> -> vector<6x392xf32>
    %14 = arith.maximumf %10, %13 : vector<6x392xf32>
    %15 = arith.maximumf %7, %14 : vector<6x392xf32>
    %c0_13 = arith.constant 0 : index
    %c0_14 = arith.constant 0 : index
    %16 = vector.load %arg3[%c0_13, %c0_14] : memref<6x1xf32, #tpu.memory_space<vmem>>, vector<6x1xf32>
    %17 = vector.broadcast %16 : vector<6x1xf32> to vector<6x392xf32>
    %18 = arith.addf %15, %17 : vector<6x392xf32>
    %cst_15 = arith.constant 0.000000e+00 : f32
    %19 = vector.broadcast %cst_15 : f32 to vector<6x392xf32>
    %20 = arith.maximumf %18, %19 : vector<6x392xf32>
    %21 = arith.truncf %20 : vector<6x392xf32> to vector<6x392xbf16>
    %c0_16 = arith.constant 0 : index
    %c0_17 = arith.constant 0 : index
    %22 = vector.load %arg4[%c0_16, %c0_17] : memref<6x392xbf16, #tpu.memory_space<vmem>>, vector<6x392xbf16>
    tpu.vector_store %arg4[%c0_16, %c0_17], %21 {strides = array<i32>} : memref<6x392xbf16, #tpu.memory_space<vmem>>, vector<6x392xbf16>,
    return
  }
  func.func @transform_0(%arg0: i32) -> (i32, i32) {
    %c0_i32 = arith.constant 0 : i32
    %c0_i32_0 = arith.constant 0 : i32
    return %c0_i32, %arg0 : i32, i32
  }
  func.func @transform_1(%arg0: i32) -> (i32, i32, i32) {
    %c0_i32 = arith.constant 0 : i32
    %c0_i32_0 = arith.constant 0 : i32
    %c0_i32_1 = arith.constant 0 : i32
    %c0_i32_2 = arith.constant 0 : i32
    return %c0_i32, %c0_i32_0, %c0_i32_1 : i32, i32, i32
  }
  func.func @transform_2(%arg0: i32) -> (i32, i32) {
    %c0_i32 = arith.constant 0 : i32
    %c0_i32_0 = arith.constant 0 : i32
    %c0_i32_1 = arith.constant 0 : i32
    return %c0_i32, %c0_i32_0 : i32, i32
  }
  func.func @transform_3(%arg0: i32) -> (i32, i32) {
    %c0_i32 = arith.constant 0 : i32
    %c0_i32_0 = arith.constant 0 : i32
    return %c0_i32, %arg0 : i32, i32
  }
}

module attributes {stable_mosaic.version = 11 : i64} {
  func.func @_conv_pool_kernel(%arg0: i32, %arg1: memref<216x50xbf16, #tpu.memory_space<vmem>>, %arg2: memref<4x16x216xbf16, #tpu.memory_space<vmem>>, %arg3: memref<16x1xf32, #tpu.memory_space<vmem>>, %arg4: memref<16x50xbf16, #tpu.memory_space<vmem>>) attributes {dimension_semantics = [#tpu.dimension_semantics<parallel>], iteration_bounds = array<i64: 1>, scalar_prefetch = 0 : i64, scratch_operands = 0 : i64, tpu.core_type = #tpu.core_type<tc>, window_params = [{transform_indices = @transform_0, window_bounds = array<i64: 216, 50>}, {pipeline_mode = #tpu.pipeline_mode<synchronous>, transform_indices = @transform_1, window_bounds = array<i64: 4, 16, 216>}, {pipeline_mode = #tpu.pipeline_mode<synchronous>, transform_indices = @transform_2, window_bounds = array<i64: 16, 1>}, {transform_indices = @transform_3, window_bounds = array<i64: 16, 50>}]} {
    %c0 = arith.constant 0 : index
    %c0_0 = arith.constant 0 : index
    %0 = vector.load %arg1[%c0, %c0_0] : memref<216x50xbf16, #tpu.memory_space<vmem>>, vector<216x50xbf16>
    %c0_1 = arith.constant 0 : index
    %c0_2 = arith.constant 0 : index
    %c0_3 = arith.constant 0 : index
    %1 = vector.load %arg2[%c0_1, %c0_2, %c0_3] : memref<4x16x216xbf16, #tpu.memory_space<vmem>>, vector<1x16x216xbf16>
    %2 = vector.shape_cast %1 : vector<1x16x216xbf16> to vector<16x216xbf16>
    %cst = arith.constant dense<0.000000e+00> : vector<16x50xf32>
    %3 = tpu.matmul %2, %0, %cst {dimension_numbers = #tpu.dot_dimension_numbers<[1], [0], [0], [1], [0, 0, 1, 1], [], []>} : vector<16x216xbf16>, vector<216x50xbf16>, vector<16x50xf32> -> vector<16x50xf32>
    %c1 = arith.constant 1 : index
    %c0_4 = arith.constant 0 : index
    %c0_5 = arith.constant 0 : index
    %4 = vector.load %arg2[%c1, %c0_4, %c0_5] : memref<4x16x216xbf16, #tpu.memory_space<vmem>>, vector<1x16x216xbf16>
    %5 = vector.shape_cast %4 : vector<1x16x216xbf16> to vector<16x216xbf16>
    %cst_6 = arith.constant dense<0.000000e+00> : vector<16x50xf32>
    %6 = tpu.matmul %5, %0, %cst_6 {dimension_numbers = #tpu.dot_dimension_numbers<[1], [0], [0], [1], [0, 0, 1, 1], [], []>} : vector<16x216xbf16>, vector<216x50xbf16>, vector<16x50xf32> -> vector<16x50xf32>
    %7 = arith.maximumf %3, %6 : vector<16x50xf32>
    %c2 = arith.constant 2 : index
    %c0_7 = arith.constant 0 : index
    %c0_8 = arith.constant 0 : index
    %8 = vector.load %arg2[%c2, %c0_7, %c0_8] : memref<4x16x216xbf16, #tpu.memory_space<vmem>>, vector<1x16x216xbf16>
    %9 = vector.shape_cast %8 : vector<1x16x216xbf16> to vector<16x216xbf16>
    %cst_9 = arith.constant dense<0.000000e+00> : vector<16x50xf32>
    %10 = tpu.matmul %9, %0, %cst_9 {dimension_numbers = #tpu.dot_dimension_numbers<[1], [0], [0], [1], [0, 0, 1, 1], [], []>} : vector<16x216xbf16>, vector<216x50xbf16>, vector<16x50xf32> -> vector<16x50xf32>
    %c3 = arith.constant 3 : index
    %c0_10 = arith.constant 0 : index
    %c0_11 = arith.constant 0 : index
    %11 = vector.load %arg2[%c3, %c0_10, %c0_11] : memref<4x16x216xbf16, #tpu.memory_space<vmem>>, vector<1x16x216xbf16>
    %12 = vector.shape_cast %11 : vector<1x16x216xbf16> to vector<16x216xbf16>
    %cst_12 = arith.constant dense<0.000000e+00> : vector<16x50xf32>
    %13 = tpu.matmul %12, %0, %cst_12 {dimension_numbers = #tpu.dot_dimension_numbers<[1], [0], [0], [1], [0, 0, 1, 1], [], []>} : vector<16x216xbf16>, vector<216x50xbf16>, vector<16x50xf32> -> vector<16x50xf32>
    %14 = arith.maximumf %10, %13 : vector<16x50xf32>
    %15 = arith.maximumf %7, %14 : vector<16x50xf32>
    %c0_13 = arith.constant 0 : index
    %c0_14 = arith.constant 0 : index
    %16 = vector.load %arg3[%c0_13, %c0_14] : memref<16x1xf32, #tpu.memory_space<vmem>>, vector<16x1xf32>
    %17 = vector.broadcast %16 : vector<16x1xf32> to vector<16x50xf32>
    %18 = arith.addf %15, %17 : vector<16x50xf32>
    %cst_15 = arith.constant 0.000000e+00 : f32
    %19 = vector.broadcast %cst_15 : f32 to vector<16x50xf32>
    %20 = arith.maximumf %18, %19 : vector<16x50xf32>
    %21 = arith.truncf %20 : vector<16x50xf32> to vector<16x50xbf16>
    %c0_16 = arith.constant 0 : index
    %c0_17 = arith.constant 0 : index
    %22 = vector.load %arg4[%c0_16, %c0_17] : memref<16x50xbf16, #tpu.memory_space<vmem>>, vector<16x50xbf16>
    tpu.vector_store %arg4[%c0_16, %c0_17], %21 {strides = array<i32>} : memref<16x50xbf16, #tpu.memory_space<vmem>>, vector<16x50xbf16>,
    return
  }
  func.func @transform_0(%arg0: i32) -> (i32, i32) {
    %c0_i32 = arith.constant 0 : i32
    %c0_i32_0 = arith.constant 0 : i32
    return %c0_i32, %arg0 : i32, i32
  }
  func.func @transform_1(%arg0: i32) -> (i32, i32, i32) {
    %c0_i32 = arith.constant 0 : i32
    %c0_i32_0 = arith.constant 0 : i32
    %c0_i32_1 = arith.constant 0 : i32
    %c0_i32_2 = arith.constant 0 : i32
    return %c0_i32, %c0_i32_0, %c0_i32_1 : i32, i32, i32
  }
  func.func @transform_2(%arg0: i32) -> (i32, i32) {
    %c0_i32 = arith.constant 0 : i32
    %c0_i32_0 = arith.constant 0 : i32
    %c0_i32_1 = arith.constant 0 : i32
    return %c0_i32, %c0_i32_0 : i32, i32
  }
  func.func @transform_3(%arg0: i32) -> (i32, i32) {
    %c0_i32 = arith.constant 0 : i32
    %c0_i32_0 = arith.constant 0 : i32
    return %c0_i32, %arg0 : i32, i32
  }
}

module attributes {stable_mosaic.version = 11 : i64} {
  func.func @_fc_chain_kernel(%arg0: i32, %arg1: memref<2x400xbf16, #tpu.memory_space<vmem>>, %arg2: memref<400x120xbf16, #tpu.memory_space<vmem>>, %arg3: memref<1x120xf32, #tpu.memory_space<vmem>>, %arg4: memref<120x84xbf16, #tpu.memory_space<vmem>>, %arg5: memref<1x84xf32, #tpu.memory_space<vmem>>, %arg6: memref<84x10xbf16, #tpu.memory_space<vmem>>, %arg7: memref<1x10xf32, #tpu.memory_space<vmem>>, %arg8: memref<2x10xf32, #tpu.memory_space<vmem>>) attributes {dimension_semantics = [#tpu.dimension_semantics<parallel>], iteration_bounds = array<i64: 1>, scalar_prefetch = 0 : i64, scratch_operands = 0 : i64, tpu.core_type = #tpu.core_type<tc>, window_params = [{transform_indices = @transform_0, window_bounds = array<i64: 2, 400>}, {pipeline_mode = #tpu.pipeline_mode<synchronous>, transform_indices = @transform_1, window_bounds = array<i64: 400, 120>}, {pipeline_mode = #tpu.pipeline_mode<synchronous>, transform_indices = @transform_2, window_bounds = array<i64: 1, 120>}, {pipeline_mode = #tpu.pipeline_mode<synchronous>, transform_indices = @transform_3, window_bounds = array<i64: 120, 84>}, {pipeline_mode = #tpu.pipeline_mode<synchronous>, transform_indices = @transform_4, window_bounds = array<i64: 1, 84>}, {pipeline_mode = #tpu.pipeline_mode<synchronous>, transform_indices = @transform_5, window_bounds = array<i64: 84, 10>}, {pipeline_mode = #tpu.pipeline_mode<synchronous>, transform_indices = @transform_6, window_bounds = array<i64: 1, 10>}, {transform_indices = @transform_7, window_bounds = array<i64: 2, 10>}]} {
    %c0 = arith.constant 0 : index
    %c0_0 = arith.constant 0 : index
    %0 = vector.load %arg1[%c0, %c0_0] : memref<2x400xbf16, #tpu.memory_space<vmem>>, vector<2x400xbf16>
    %c0_1 = arith.constant 0 : index
    %c0_2 = arith.constant 0 : index
    %1 = vector.load %arg2[%c0_1, %c0_2] : memref<400x120xbf16, #tpu.memory_space<vmem>>, vector<400x120xbf16>
    %cst = arith.constant dense<0.000000e+00> : vector<2x120xf32>
    %2 = tpu.matmul %0, %1, %cst {dimension_numbers = #tpu.dot_dimension_numbers<[1], [0], [0], [1], [0, 0, 1, 1], [], []>} : vector<2x400xbf16>, vector<400x120xbf16>, vector<2x120xf32> -> vector<2x120xf32>
    %c0_3 = arith.constant 0 : index
    %c0_4 = arith.constant 0 : index
    %3 = vector.load %arg3[%c0_3, %c0_4] : memref<1x120xf32, #tpu.memory_space<vmem>>, vector<1x120xf32>
    %4 = vector.broadcast %3 : vector<1x120xf32> to vector<2x120xf32>
    %5 = arith.addf %2, %4 : vector<2x120xf32>
    %cst_5 = arith.constant 0.000000e+00 : f32
    %6 = vector.broadcast %cst_5 : f32 to vector<2x120xf32>
    %7 = arith.maximumf %5, %6 : vector<2x120xf32>
    %8 = arith.truncf %7 : vector<2x120xf32> to vector<2x120xbf16>
    %c0_6 = arith.constant 0 : index
    %c0_7 = arith.constant 0 : index
    %9 = vector.load %arg4[%c0_6, %c0_7] : memref<120x84xbf16, #tpu.memory_space<vmem>>, vector<120x84xbf16>
    %cst_8 = arith.constant dense<0.000000e+00> : vector<2x84xf32>
    %10 = tpu.matmul %8, %9, %cst_8 {dimension_numbers = #tpu.dot_dimension_numbers<[1], [0], [0], [1], [0, 0, 1, 1], [], []>} : vector<2x120xbf16>, vector<120x84xbf16>, vector<2x84xf32> -> vector<2x84xf32>
    %c0_9 = arith.constant 0 : index
    %c0_10 = arith.constant 0 : index
    %11 = vector.load %arg5[%c0_9, %c0_10] : memref<1x84xf32, #tpu.memory_space<vmem>>, vector<1x84xf32>
    %12 = vector.broadcast %11 : vector<1x84xf32> to vector<2x84xf32>
    %13 = arith.addf %10, %12 : vector<2x84xf32>
    %cst_11 = arith.constant 0.000000e+00 : f32
    %14 = vector.broadcast %cst_11 : f32 to vector<2x84xf32>
    %15 = arith.maximumf %13, %14 : vector<2x84xf32>
    %16 = arith.truncf %15 : vector<2x84xf32> to vector<2x84xbf16>
    %c0_12 = arith.constant 0 : index
    %c0_13 = arith.constant 0 : index
    %17 = vector.load %arg6[%c0_12, %c0_13] : memref<84x10xbf16, #tpu.memory_space<vmem>>, vector<84x10xbf16>
    %cst_14 = arith.constant dense<0.000000e+00> : vector<2x10xf32>
    %18 = tpu.matmul %16, %17, %cst_14 {dimension_numbers = #tpu.dot_dimension_numbers<[1], [0], [0], [1], [0, 0, 1, 1], [], []>} : vector<2x84xbf16>, vector<84x10xbf16>, vector<2x10xf32> -> vector<2x10xf32>
    %c0_15 = arith.constant 0 : index
    %c0_16 = arith.constant 0 : index
    %19 = vector.load %arg7[%c0_15, %c0_16] : memref<1x10xf32, #tpu.memory_space<vmem>>, vector<1x10xf32>
    %20 = vector.broadcast %19 : vector<1x10xf32> to vector<2x10xf32>
    %21 = arith.addf %18, %20 : vector<2x10xf32>
    %c0_17 = arith.constant 0 : index
    %c0_18 = arith.constant 0 : index
    %22 = vector.load %arg8[%c0_17, %c0_18] : memref<2x10xf32, #tpu.memory_space<vmem>>, vector<2x10xf32>
    tpu.vector_store %arg8[%c0_17, %c0_18], %21 {strides = array<i32>} : memref<2x10xf32, #tpu.memory_space<vmem>>, vector<2x10xf32>,
    return
  }
  func.func @transform_0(%arg0: i32) -> (i32, i32) {
    %c0_i32 = arith.constant 0 : i32
    %c0_i32_0 = arith.constant 0 : i32
    return %arg0, %c0_i32 : i32, i32
  }
  func.func @transform_1(%arg0: i32) -> (i32, i32) {
    %c0_i32 = arith.constant 0 : i32
    %c0_i32_0 = arith.constant 0 : i32
    %c0_i32_1 = arith.constant 0 : i32
    return %c0_i32, %c0_i32_0 : i32, i32
  }
  func.func @transform_2(%arg0: i32) -> (i32, i32) {
    %c0_i32 = arith.constant 0 : i32
    %c0_i32_0 = arith.constant 0 : i32
    %c0_i32_1 = arith.constant 0 : i32
    return %c0_i32, %c0_i32_0 : i32, i32
  }
  func.func @transform_3(%arg0: i32) -> (i32, i32) {
    %c0_i32 = arith.constant 0 : i32
    %c0_i32_0 = arith.constant 0 : i32
    %c0_i32_1 = arith.constant 0 : i32
    return %c0_i32, %c0_i32_0 : i32, i32
  }
  func.func @transform_4(%arg0: i32) -> (i32, i32) {
    %c0_i32 = arith.constant 0 : i32
    %c0_i32_0 = arith.constant 0 : i32
    %c0_i32_1 = arith.constant 0 : i32
    return %c0_i32, %c0_i32_0 : i32, i32
  }
  func.func @transform_5(%arg0: i32) -> (i32, i32) {
    %c0_i32 = arith.constant 0 : i32
    %c0_i32_0 = arith.constant 0 : i32
    %c0_i32_1 = arith.constant 0 : i32
    return %c0_i32, %c0_i32_0 : i32, i32
  }
  func.func @transform_6(%arg0: i32) -> (i32, i32) {
    %c0_i32 = arith.constant 0 : i32
    %c0_i32_0 = arith.constant 0 : i32
    %c0_i32_1 = arith.constant 0 : i32
    return %c0_i32, %c0_i32_0 : i32, i32
  }
  func.func @transform_7(%arg0: i32) -> (i32, i32) {
    %c0_i32 = arith.constant 0 : i32
    %c0_i32_0 = arith.constant 0 : i32
    return %arg0, %c0_i32 : i32, i32
  }
}

</mosaic_0001>

<bundles_post_ra>
// kernel: net_forward.3
= control target key start
LH: loop header
LB: loop body
LE: loop exit
PB: predicated region body
PF: predicated region fallthrough
CT: control target
= control target key end

     0   :  { %v686_v1 = vmov 0   ;;  %vm184_vm0 = vcmask 1045504   ;;  %vm180_vm1 = vcmask 883712   ;;  %vm583_vm2 = vcmask 1042432   ;;  %s1007_s0 = inlined_call_operand.vmem [shape: bf16[108,392], index: 0, kind: input, shape index: {}]   ;;  %s1008_s2 = inlined_call_operand.vmem [shape: f32[6,1], index: 2, kind: input, shape index: {}]   ;;  %s1009_s1 = inlined_call_operand.vmem [shape: bf16[4,6,108], index: 1, kind: input, shape index: {}]   ;;  %s1010_s3 = inlined_call_operand.vmem [shape: bf16[6,392], index: 3, kind: output, shape index: {}]  }
   0x1   :  { %v710_v0 = vld [vmem:[%s1007_s0 + $0x4] ss:$16 sps:$4 sm:$0xff]   ;;  %229 = vmatprep.mubr.bf16.mxu0 %v686_v1  ;;  %270 = vmatprep.mubr.bf16.mxu1 %v686_v1  ;;  %v717_v2 = vld [vmem:[%s1007_s0 + $0xc] ss:$16 sps:$4 sm:$0xff]   ;;  %v724_v3 = vld [vmem:[%s1007_s0] ss:$16 sps:$4 sm:$0xff]  }
   0x2   :  { %643 = vset.pattern.permute.xlu0 %v686_v1  ;;  %197 = vmatprep.subr.bf16.mxu0 %v710_v0  ;;  %v729_v4 = vld [vmem:[%s1007_s0 + $0x8] ss:$16 sps:$4 sm:$0xff]   ;;  %v735_v5 = vld [vmem:[%s1007_s0 + $0x24] ss:$16 sps:$4 sm:$0xff]   ;;  %v742_v6 = vld [vmem:[%s1007_s0 + $0x2c] ss:$16 sps:$4 sm:$0xff]  }
   0x3   :  { %238 = vmatprep.subr.bf16.mxu1 %v717_v2  ;;  %198 = vmatpush1.bf16.msra.mxu0 %v724_v3  ;;  %v747_v7 = vld [vmem:[%s1007_s0 + $0x20] ss:$16 sps:$4 sm:$0xff]   ;;  %v753_v8 = vld [vmem:[%s1007_s0 + $0x28] ss:$16 sps:$4 sm:$0xff]   ;;  %v759_v9 = vld [vmem:[%s1007_s0 + $0x44] ss:$16 sps:$4 sm:$0xff]  }
   0x4   :  { %239 = vmatpush1.bf16.msra.mxu1 %v729_v4  ;;  %199 = vmatprep.subr.bf16.mxu0 %v735_v5  ;;  %v764_v10 = vld [vmem:[%s1007_s0 + $0x4c] ss:$16 sps:$4 sm:$0xff]   ;;  %v769_v11 = vld [vmem:[%s1007_s0 + $0x40] ss:$16 sps:$4 sm:$0xff]   ;;  %v774_v12 = vld [vmem:[%s1007_s0 + $0x48] ss:$16 sps:$4 sm:$0xff]  }
   0x5   :  { %240 = vmatprep.subr.bf16.mxu1 %v742_v6  ;;  %v781_v13 = vld [vmem:[%s1007_s0 + $0x64] ss:$16 sps:$4 sm:$0xff]   ;;  %v788_v14 = vld [vmem:[%s1007_s0 + $0x6c] ss:$16 sps:$4 sm:$0xff]   ;;  %v793_v15 = vld [vmem:[%s1007_s0 + $0x60] ss:$16 sps:$4 sm:$0xff]  }
   0x6   :  { %v800_v16 = vld [vmem:[%s1007_s0 + $0x68] ss:$16 sps:$4 sm:$0xff]   ;;  %v805_v17 = vld [vmem:[%s1007_s0 + $0x84] ss:$16 sps:$4 sm:$0xff]   ;;  %v812_v18 = vld [vmem:[%s1007_s0 + $0x8c] ss:$16 sps:$4 sm:$0xff]  }
   0x7   :  { %200 = vmatpush1.bf16.msra.mxu0 %v747_v7  ;;  %v817_v19 = vld [vmem:[%s1007_s0 + $0x80] ss:$16 sps:$4 sm:$0xff]   ;;  %v822_v20 = vld [vmem:[%s1007_s0 + $0x88] ss:$16 sps:$4 sm:$0xff]   ;;  %v829_v21 = vld [vmem:[%s1007_s0 + $0xa4] ss:$16 sps:$4 sm:$0xff]  }
   0x8   :  { %241 = vmatpush1.bf16.msra.mxu1 %v753_v8  ;;  %201 = vmatprep.subr.bf16.mxu0 %v759_v9  ;;  %v836_v22 = vld [vmem:[%s1007_s0 + $0xac] ss:$16 sps:$4 sm:$0xff]   ;;  %v841_v23 = vld [vmem:[%s1007_s0 + $0xa0] ss:$16 sps:$4 sm:$0xff]   ;;  %v846_v24 = vld [vmem:[%s1007_s0 + $0xa8] ss:$16 sps:$4 sm:$0xff]  }
   0x9   :  { %242 = vmatprep.subr.bf16.mxu1 %v764_v10  ;;  %v851_v25 = vld [vmem:[%s1007_s0 + $0xc4] ss:$16 sps:$4 sm:$0x3f]   ;;  %v858_v26 = vld [vmem:[%s1007_s0 + $0xcc] ss:$16 sps:$4 sm:$0x3f]  }
   0xa   :  { %v552_v27 = vld [vmem:[%s1008_s2] sm:$0x3f]  ;;  %v685_v29 = vld [vmem:[%s1007_s0 + $0xc8] ss:$16 sps:$4 sm:$0x3f]   ;;  %vm584_vm3 = vcmask 63492  }
   0xb   :  { %202 = vmatpush1.bf16.msra.mxu0 %v769_v11  ;;  %v684_v28 = vld [vmem:[%s1007_s0 + $0xc0] ss:$16 sps:$4 sm:$0x3f]   ;;  %555 = vperm.xlu0 %643, %v552_v27   ;;  %v881_v31 = vsel %vm184_vm0, %v685_v29, 0  ;;  %v623_v33 = vld [vmem:[%s1009_s1 + $0x4] sm:$0x7]  ;;  %vm585_vm4 = vmor %vm584_vm3, %vm583_vm2 }
   0xc   :  { %243 = vmatpush1.bf16.msra.mxu1 %v774_v12  ;;  %203 = vmatprep.subr.bf16.mxu0 %v781_v13  ;;  %v878_v30 = vsel %vm184_vm0, %v684_v28, 0  ;;  %v43_v32 = vld [vmem:[%s1009_s1] sm:$0x7]  ;;  %v628_v34 = vld [vmem:[%s1009_s1 + $0x8] sm:$0x7] }
   0xd   :  { %244 = vmatprep.subr.bf16.mxu1 %v788_v14  ;;  %v633_v35 = vld [vmem:[%s1009_s1 + $0xc] sm:$0x7] }
   0xf   :  { %204 = vmatpush1.bf16.msra.mxu0 %v793_v15 }
  0x10   :  { %245 = vmatpush1.bf16.msra.mxu1 %v800_v16  ;;  %205 = vmatprep.subr.bf16.mxu0 %v805_v17 }
  0x11   :  { %246 = vmatprep.subr.bf16.mxu1 %v812_v18 }
  0x13   :  { %206 = vmatpush1.bf16.msra.mxu0 %v817_v19 }
  0x14   :  { %247 = vmatpush1.bf16.msra.mxu1 %v822_v20  ;;  %207 = vmatprep.subr.bf16.mxu0 %v829_v21 }
  0x15   :  { %248 = vmatprep.subr.bf16.mxu1 %v836_v22 }
  0x17   :  { %208 = vmatpush1.bf16.msra.mxu0 %v841_v23 }
  0x18   :  { %249 = vmatpush1.bf16.msra.mxu1 %v846_v24  ;;  %619 = vmatprep.subr.msk.bf16.mxu0 %vm184_vm0, %v851_v25 }
  0x19   :  { %621 = vmatprep.subr.msk.bf16.mxu1 %vm184_vm0, %v858_v26 }
  0x1b   :  { %210 = vmatpush1.bf16.msra.mxu0 %v878_v30 }
  0x1c   :  { %251 = vmatpush1.bf16.msra.mxu1 %v881_v31  ;;  %284 = vmatprep.subr.bf16.mxu0 %v710_v0 }
  0x1d   :  { %325 = vmatprep.subr.bf16.mxu1 %v717_v2 }
  0x1e   :  { %620 = vmatmul.mubr.msk.bf16.vlgmr.msra.gmra.mrb[0].mxu0 %vm180_vm1, %v43_v32 }
  0x1f   :  { %622 = vmatmul.mubr.msk.bf16.vlgmr.msra.gmra.mrb[0].mxu1 %vm180_vm1, %v43_v32  ;;  %285 = vmatpush1.bf16.msra.mxu0 %v724_v3 }
  0x20   :  { %326 = vmatpush1.bf16.msra.mxu1 %v729_v4  ;;  %286 = vmatprep.subr.bf16.mxu0 %v735_v5 }
  0x21   :  { %327 = vmatprep.subr.bf16.mxu1 %v742_v6  ;;  %316 = vmatprep.mubr.bf16.mxu0 %v686_v1 }
  0x22   :  { %357 = vmatprep.mubr.bf16.mxu1 %v686_v1 }
  0x23   :  { %287 = vmatpush1.bf16.msra.mxu0 %v747_v7 }
  0x24   :  { %328 = vmatpush1.bf16.msra.mxu1 %v753_v8  ;;  %288 = vmatprep.subr.bf16.mxu0 %v759_v9 }
  0x25   :  { %329 = vmatprep.subr.bf16.mxu1 %v764_v10 }
  0x27   :  { %289 = vmatpush1.bf16.msra.mxu0 %v769_v11 }
  0x28   :  { %330 = vmatpush1.bf16.msra.mxu1 %v774_v12  ;;  %290 = vmatprep.subr.bf16.mxu0 %v781_v13 }
  0x29   :  { %331 = vmatprep.subr.bf16.mxu1 %v788_v14 }
  0x2b   :  { %291 = vmatpush1.bf16.msra.mxu0 %v793_v15 }
  0x2c   :  { %332 = vmatpush1.bf16.msra.mxu1 %v800_v16  ;;  %292 = vmatprep.subr.bf16.mxu0 %v805_v17 }
  0x2d   :  { %333 = vmatprep.subr.bf16.mxu1 %v812_v18 }
  0x2f   :  { %293 = vmatpush1.bf16.msra.mxu0 %v817_v19 }
  0x30   :  { %334 = vmatpush1.bf16.msra.mxu1 %v822_v20  ;;  %294 = vmatprep.subr.bf16.mxu0 %v829_v21 }
  0x31   :  { %335 = vmatprep.subr.bf16.mxu1 %v836_v22 }
  0x33   :  { %295 = vmatpush1.bf16.msra.mxu0 %v841_v23 }
  0x34   :  { %336 = vmatpush1.bf16.msra.mxu1 %v846_v24  ;;  %624 = vmatprep.subr.msk.bf16.mxu0 %vm184_vm0, %v851_v25 }
  0x35   :  { %626 = vmatprep.subr.msk.bf16.mxu1 %vm184_vm0, %v858_v26 }
  0x37   :  { %297 = vmatpush1.bf16.msra.mxu0 %v878_v30 }
  0x38   :  { %338 = vmatpush1.bf16.msra.mxu1 %v881_v31  ;;  %375 = vmatprep.subr.bf16.mxu0 %v710_v0 }
  0x39   :  { %416 = vmatprep.subr.bf16.mxu1 %v717_v2 }
  0x3a   :  { %625 = vmatmul.mubr.msk.bf16.vlgmr.msra.gmra.mrb[4].mxu0 %vm180_vm1, %v623_v33 }
  0x3b   :  { %627 = vmatmul.mubr.msk.bf16.vlgmr.msra.gmra.mrb[4].mxu1 %vm180_vm1, %v623_v33  ;;  %376 = vmatpush1.bf16.msra.mxu0 %v724_v3 }
  0x3c   :  { %417 = vmatpush1.bf16.msra.mxu1 %v729_v4  ;;  %377 = vmatprep.subr.bf16.mxu0 %v735_v5 }
  0x3d   :  { %418 = vmatprep.subr.bf16.mxu1 %v742_v6  ;;  %407 = vmatprep.mubr.bf16.mxu0 %v686_v1 }
  0x3e   :  { %448 = vmatprep.mubr.bf16.mxu1 %v686_v1 }
  0x3f   :  { %378 = vmatpush1.bf16.msra.mxu0 %v747_v7 }
  0x40   :  { %419 = vmatpush1.bf16.msra.mxu1 %v753_v8  ;;  %379 = vmatprep.subr.bf16.mxu0 %v759_v9 }
  0x41   :  { %420 = vmatprep.subr.bf16.mxu1 %v764_v10 }
  0x43   :  { %380 = vmatpush1.bf16.msra.mxu0 %v769_v11 }
  0x44   :  { %421 = vmatpush1.bf16.msra.mxu1 %v774_v12  ;;  %381 = vmatprep.subr.bf16.mxu0 %v781_v13 }
  0x45   :  { %422 = vmatprep.subr.bf16.mxu1 %v788_v14 }
  0x47   :  { %382 = vmatpush1.bf16.msra.mxu0 %v793_v15 }
  0x48   :  { %423 = vmatpush1.bf16.msra.mxu1 %v800_v16  ;;  %383 = vmatprep.subr.bf16.mxu0 %v805_v17 }
  0x49   :  { %424 = vmatprep.subr.bf16.mxu1 %v812_v18 }
  0x4b   :  { %384 = vmatpush1.bf16.msra.mxu0 %v817_v19 }
  0x4c   :  { %425 = vmatpush1.bf16.msra.mxu1 %v822_v20  ;;  %385 = vmatprep.subr.bf16.mxu0 %v829_v21 }
  0x4d   :  { %426 = vmatprep.subr.bf16.mxu1 %v836_v22 }
  0x4f   :  { %386 = vmatpush1.bf16.msra.mxu0 %v841_v23 }
  0x50   :  { %427 = vmatpush1.bf16.msra.mxu1 %v846_v24  ;;  %629 = vmatprep.subr.msk.bf16.mxu0 %vm184_vm0, %v851_v25 }
  0x51   :  { %631 = vmatprep.subr.msk.bf16.mxu1 %vm184_vm0, %v858_v26 }
  0x53   :  { %388 = vmatpush1.bf16.msra.mxu0 %v878_v30 }
  0x54   :  { %429 = vmatpush1.bf16.msra.mxu1 %v881_v31  ;;  %462 = vmatprep.subr.bf16.mxu0 %v710_v0 }
  0x55   :  { %503 = vmatprep.subr.bf16.mxu1 %v717_v2 }
  0x56   :  { %630 = vmatmul.mubr.msk.bf16.vlgmr.msra.gmra.mrb[8].mxu0 %vm180_vm1, %v628_v34 }
  0x57   :  { %632 = vmatmul.mubr.msk.bf16.vlgmr.msra.gmra.mrb[8].mxu1 %vm180_vm1, %v628_v34  ;;  %463 = vmatpush1.bf16.msra.mxu0 %v724_v3 }
  0x58   :  { %504 = vmatpush1.bf16.msra.mxu1 %v729_v4  ;;  %464 = vmatprep.subr.bf16.mxu0 %v735_v5 }
  0x59   :  { %505 = vmatprep.subr.bf16.mxu1 %v742_v6  ;;  %494 = vmatprep.mubr.bf16.mxu0 %v686_v1 }
  0x5a   :  { %535 = vmatprep.mubr.bf16.mxu1 %v686_v1 }
  0x5b   :  { %465 = vmatpush1.bf16.msra.mxu0 %v747_v7 }
  0x5c   :  { %506 = vmatpush1.bf16.msra.mxu1 %v753_v8  ;;  %466 = vmatprep.subr.bf16.mxu0 %v759_v9 }
  0x5d   :  { %507 = vmatprep.subr.bf16.mxu1 %v764_v10 }
  0x5f   :  { %467 = vmatpush1.bf16.msra.mxu0 %v769_v11 }
  0x60   :  { %508 = vmatpush1.bf16.msra.mxu1 %v774_v12  ;;  %468 = vmatprep.subr.bf16.mxu0 %v781_v13 }
  0x61   :  { %509 = vmatprep.subr.bf16.mxu1 %v788_v14 }
  0x63   :  { %469 = vmatpush1.bf16.msra.mxu0 %v793_v15 }
  0x64   :  { %510 = vmatpush1.bf16.msra.mxu1 %v800_v16  ;;  %470 = vmatprep.subr.bf16.mxu0 %v805_v17 }
  0x65   :  { %511 = vmatprep.subr.bf16.mxu1 %v812_v18 }
  0x67   :  { %471 = vmatpush1.bf16.msra.mxu0 %v817_v19 }
  0x68   :  { %512 = vmatpush1.bf16.msra.mxu1 %v822_v20  ;;  %472 = vmatprep.subr.bf16.mxu0 %v829_v21 }
  0x69   :  { %513 = vmatprep.subr.bf16.mxu1 %v836_v22 }
  0x6b   :  { %473 = vmatpush1.bf16.msra.mxu0 %v841_v23 }
  0x6c   :  { %514 = vmatpush1.bf16.msra.mxu1 %v846_v24  ;;  %634 = vmatprep.subr.msk.bf16.mxu0 %vm184_vm0, %v851_v25 }
  0x6d   :  { %636 = vmatprep.subr.msk.bf16.mxu1 %vm184_vm0, %v858_v26 }
  0x6f   :  { %475 = vmatpush1.bf16.msra.mxu0 %v878_v30 }
  0x70   :  { %516 = vmatpush1.bf16.msra.mxu1 %v881_v31 }
  0x72   :  { %635 = vmatmul.mubr.msk.bf16.vlgmr.msra.gmra.mrb[12].mxu0 %vm180_vm1, %v633_v35 }
  0x73   :  { %637 = vmatmul.mubr.msk.bf16.vlgmr.msra.gmra.mrb[12].mxu1 %vm180_vm1, %v633_v35 }
  0x8a   :  { %v556_v0 = vpop.permute.xlu0 %555 }
  0xf1   :  { %v231_v36 = vpop.f32.mrb[0].mxu0 }
  0xf2   :  { %v272_v37 = vpop.f32.mrb[0].mxu1  ;;  %v233_v38 = vpop.f32.mrb[1].mxu0 }
  0xf3   :  { %v274_v39 = vpop.f32.mrb[1].mxu1  ;;  %v235_v40 = vpop.f32.mrb[2].mxu0 }
  0xf4   :  { %v276_v41 = vpop.f32.mrb[2].mxu1  ;;  %v236_v42 = vpop.f32.mrb[3].mxu0 }
  0xf5   :  { %v277_v43 = vpop.f32.mrb[3].mxu1 }
 0x10d   :  { %v318_v44 = vpop.f32.mrb[4].mxu0 }
 0x10e   :  { %v359_v45 = vpop.f32.mrb[4].mxu1  ;;  %v366_v46 = vmax.f32 %v231_v36, %v318_v44  ;;  %v320_v48 = vpop.f32.mrb[5].mxu0 }
 0x10f   :  { %v368_v47 = vmax.f32 %v272_v37, %v359_v45  ;;  %v361_v49 = vpop.f32.mrb[5].mxu1  ;;  %v367_v50 = vmax.f32 %v233_v38, %v320_v48  ;;  %v322_v52 = vpop.f32.mrb[6].mxu0 }
 0x110   :  { %v369_v51 = vmax.f32 %v274_v39, %v361_v49  ;;  %v363_v53 = vpop.f32.mrb[6].mxu1  ;;  %v323_v54 = vpop.f32.mrb[7].mxu0 }
 0x111   :  { %v364_v55 = vpop.f32.mrb[7].mxu1 }
 0x129   :  { %v409_v56 = vpop.f32.mrb[8].mxu0 }
 0x12a   :  { %v450_v57 = vpop.f32.mrb[8].mxu1  ;;  %v411_v58 = vpop.f32.mrb[9].mxu0 }
 0x12b   :  { %v452_v59 = vpop.f32.mrb[9].mxu1  ;;  %v413_v60 = vpop.f32.mrb[10].mxu0 }
 0x12c   :  { %v454_v61 = vpop.f32.mrb[10].mxu1  ;;  %v414_v62 = vpop.f32.mrb[11].mxu0 }
 0x12d   :  { %v455_v63 = vpop.f32.mrb[11].mxu1 }
 0x145   :  { %v496_v1 = vpop.f32.mrb[12].mxu0 }
 0x146   :  { %v537_v2 = vpop.f32.mrb[12].mxu1  ;;  %v544_v3 = vmax.f32 %v409_v56, %v496_v1  ;;  %v498_v5 = vpop.f32.mrb[13].mxu0 }
 0x147   :  { %v546_v4 = vmax.f32 %v450_v57, %v537_v2  ;;  %v539_v6 = vpop.f32.mrb[13].mxu1  ;;  %v545_v7 = vmax.f32 %v411_v58, %v498_v5  ;;  %v500_v9 = vpop.f32.mrb[14].mxu0 }
 0x148   :  { %v547_v8 = vmax.f32 %v452_v59, %v539_v6  ;;  %v541_v10 = vpop.f32.mrb[14].mxu1  ;;  %v548_v11 = vmax.f32 %v366_v46, %v544_v3  ;;  %v501_v13 = vpop.f32.mrb[15].mxu0 }
 0x149   :  { %v550_v12 = vmax.f32 %v368_v47, %v546_v4  ;;  %v542_v14 = vpop.f32.mrb[15].mxu1  ;;  %v549_v15 = vmax.f32 %v367_v50, %v545_v7 }
 0x14a   :  { %v551_v16 = vmax.f32 %v369_v51, %v547_v8  ;;  %v558_v17 = vadd.f32 %v556_v0, %v548_v11 }
 0x14b   :  { %v560_v18 = vadd.f32 %v556_v0, %v550_v12  ;;  %v559_v19 = vadd.f32 %v556_v0, %v549_v15 }
 0x14c   :  { %v561_v20 = vadd.f32 %v556_v0, %v551_v16  ;;  %v562_v21 = vmax.f32 %v558_v17, 0.0 }
 0x14d   :  { %v564_v22 = vmax.f32 %v560_v18, 0.0  ;;  %v563_v23 = vmax.f32 %v559_v19, 0.0 }
 0x14e   :  { %v565_v24 = vmax.f32 %v561_v20, 0.0 }
 0x14f   :  { %v640_v25 = vpack.c.bf16 %v563_v23, %v562_v21 }
 0x150   :  { %v641_v26 = vpack.c.bf16 %v565_v24, %v564_v22 }
 0x151   :  { %582 = vst [vmem:[%s1010_s3] sm:$0x77] %v640_v25 }
 0x152   :  { %586 = vst.msk [vmem:[%s1010_s3 + $0x8] sm:$0x77] %vm585_vm4, %v641_v26 }

// kernel: net_forward.4
= control target key start
LH: loop header
LB: loop body
LE: loop exit
PB: predicated region body
PF: predicated region fallthrough
CT: control target
= control target key end

     0   :  { %v452_v0 = vmov 0   ;;  %vm134_vm0 = vcmask 719872   ;;  %vm138_vm1 = vcmask 1043456   ;;  %vm381_vm2 = vcmask 404480   ;;  %s696_s0 = inlined_call_operand.vmem [shape: bf16[216,50], index: 0, kind: input, shape index: {}]   ;;  %s697_s1 = inlined_call_operand.vmem [shape: bf16[4,16,216], index: 1, kind: input, shape index: {}]   ;;  %s698_s2 = inlined_call_operand.vmem [shape: f32[16,1], index: 2, kind: input, shape index: {}]   ;;  %s699_s3 = inlined_call_operand.vmem [shape: bf16[16,50], index: 3, kind: output, shape index: {}]  }
   0x1   :  { %142 = vmatprep.subr.bf16.mxu0 %v452_v0  ;;  %198 = vmatprep.subr.bf16.mxu1 %v452_v0  ;;  %v478_v1 = vld [vmem:[%s696_s0] sm:$0xff]   ;;  %v486_v2 = vld [vmem:[%s696_s0 + $0x8] sm:$0xff]   ;;  %v495_v3 = vld [vmem:[%s696_s0 + $0x10] sm:$0xff]  }
   0x2   :  { %425 = vset.pattern.permute.xlu0 %v452_v0  ;;  %143 = vmatpush1.bf16.msra.mxu0 %v478_v1  ;;  %v504_v4 = vld [vmem:[%s696_s0 + $0x18] sm:$0xff]   ;;  %v513_v5 = vld [vmem:[%s696_s0 + $0x20] sm:$0xff]   ;;  %v529_v8 = vld [vmem:[%s696_s0 + $0x28] sm:$0xff]  }
   0x3   :  { %199 = vmatpush1.bf16.msra.mxu1 %v478_v1  ;;  %144 = vmatprep.subr.bf16.mxu0 %v452_v0  ;;  %v442_v6 = vld [vmem:[%s697_s1 + $0x4] ss:$8 sps:$4 sm:$0xff]   ;;  %v445_v7 = vld [vmem:[%s697_s1 + $0x14] ss:$8 sps:$4 sm:$0xff]   ;;  %v439_v18 = vld [vmem:[%s696_s0 + $0x68] ss:$0 sps:$4 sm:$0xff]  }
   0x4   :  { %200 = vmatprep.subr.bf16.mxu1 %v452_v0  ;;  %404 = vmatprep.mubr.msk.bf16.mxu0 %vm134_vm0, %v442_v6  ;;  %v357_v9 = vld [vmem:[%s698_s2] sm:$0xff]  ;;  %v358_v10 = vld [vmem:[%s698_s2 + $0x8] sm:$0xff]  ;;  %v545_v11 = vld [vmem:[%s696_s0 + $0x30] sm:$0xff]   ;;  %v610_v19 = vsel %vm138_vm1, %v439_v18, 0 }
   0x5   :  { %409 = vmatprep.mubr.msk.bf16.mxu1 %vm134_vm0, %v445_v7  ;;  %361 = vperm.xlu0 %425, %v357_v9   ;;  %v554_v12 = vld [vmem:[%s696_s0 + $0x38] sm:$0xff]   ;;  %v563_v13 = vld [vmem:[%s696_s0 + $0x40] sm:$0xff]   ;;  %v572_v14 = vld [vmem:[%s696_s0 + $0x48] sm:$0xff]  }
   0x6   :  { %145 = vmatpush1.bf16.msra.mxu0 %v486_v2  ;;  %v581_v15 = vld [vmem:[%s696_s0 + $0x50] sm:$0xff]   ;;  %v590_v16 = vld [vmem:[%s696_s0 + $0x58] sm:$0xff]   ;;  %v599_v17 = vld [vmem:[%s696_s0 + $0x60] sm:$0xff]  }
   0x7   :  { %201 = vmatpush1.bf16.msra.mxu1 %v486_v2  ;;  %146 = vmatprep.subr.bf16.mxu0 %v452_v0  ;;  %v440_v20 = vld [vmem:[%s697_s1] ss:$8 sps:$4 sm:$0xff]   ;;  %v443_v21 = vld [vmem:[%s697_s1 + $0x10] ss:$8 sps:$4 sm:$0xff]   ;;  %v446_v22 = vld [vmem:[%s697_s1 + $0x24] ss:$8 sps:$4 sm:$0xff]  }
   0x8   :  { %202 = vmatprep.subr.bf16.mxu1 %v452_v0  ;;  %v448_v23 = vld [vmem:[%s697_s1 + $0x34] ss:$8 sps:$4 sm:$0xff]   ;;  %v450_v24 = vld [vmem:[%s697_s1 + $0x20] ss:$8 sps:$4 sm:$0xff]   ;;  %v451_v25 = vld [vmem:[%s697_s1 + $0x30] ss:$8 sps:$4 sm:$0xff]  }
   0x9   :  { %366 = vperm.xlu0 %425, %v358_v10  }
   0xa   :  { %147 = vmatpush1.bf16.msra.mxu0 %v495_v3 }
   0xb   :  { %203 = vmatpush1.bf16.msra.mxu1 %v495_v3  ;;  %148 = vmatprep.subr.bf16.mxu0 %v452_v0 }
   0xc   :  { %204 = vmatprep.subr.bf16.mxu1 %v452_v0 }
   0xe   :  { %149 = vmatpush1.bf16.msra.mxu0 %v504_v4 }
   0xf   :  { %205 = vmatpush1.bf16.msra.mxu1 %v504_v4  ;;  %150 = vmatprep.subr.bf16.mxu0 %v452_v0 }
  0x10   :  { %206 = vmatprep.subr.bf16.mxu1 %v452_v0 }
  0x12   :  { %151 = vmatpush1.bf16.msra.mxu0 %v513_v5 }
  0x13   :  { %207 = vmatpush1.bf16.msra.mxu1 %v513_v5  ;;  %152 = vmatprep.subr.bf16.mxu0 %v452_v0 }
  0x14   :  { %208 = vmatprep.subr.bf16.mxu1 %v452_v0 }
  0x16   :  { %153 = vmatpush1.bf16.msra.mxu0 %v529_v8 }
  0x17   :  { %209 = vmatpush1.bf16.msra.mxu1 %v529_v8  ;;  %154 = vmatprep.subr.bf16.mxu0 %v452_v0 }
  0x18   :  { %210 = vmatprep.subr.bf16.mxu1 %v452_v0 }
  0x1a   :  { %155 = vmatpush1.bf16.msra.mxu0 %v545_v11 }
  0x1b   :  { %211 = vmatpush1.bf16.msra.mxu1 %v545_v11  ;;  %156 = vmatprep.subr.bf16.mxu0 %v452_v0 }
  0x1c   :  { %212 = vmatprep.subr.bf16.mxu1 %v452_v0 }
  0x1e   :  { %157 = vmatpush1.bf16.msra.mxu0 %v554_v12 }
  0x1f   :  { %213 = vmatpush1.bf16.msra.mxu1 %v554_v12  ;;  %158 = vmatprep.subr.bf16.mxu0 %v452_v0 }
  0x20   :  { %214 = vmatprep.subr.bf16.mxu1 %v452_v0 }
  0x22   :  { %159 = vmatpush1.bf16.msra.mxu0 %v563_v13 }
  0x23   :  { %215 = vmatpush1.bf16.msra.mxu1 %v563_v13  ;;  %160 = vmatprep.subr.bf16.mxu0 %v452_v0 }
  0x24   :  { %216 = vmatprep.subr.bf16.mxu1 %v452_v0 }
  0x26   :  { %161 = vmatpush1.bf16.msra.mxu0 %v572_v14 }
  0x27   :  { %217 = vmatpush1.bf16.msra.mxu1 %v572_v14  ;;  %162 = vmatprep.subr.bf16.mxu0 %v452_v0 }
  0x28   :  { %218 = vmatprep.subr.bf16.mxu1 %v452_v0 }
  0x2a   :  { %163 = vmatpush1.bf16.msra.mxu0 %v581_v15 }
  0x2b   :  { %219 = vmatpush1.bf16.msra.mxu1 %v581_v15  ;;  %164 = vmatprep.subr.bf16.mxu0 %v452_v0 }
  0x2c   :  { %220 = vmatprep.subr.bf16.mxu1 %v452_v0 }
  0x2e   :  { %165 = vmatpush1.bf16.msra.mxu0 %v590_v16 }
  0x2f   :  { %221 = vmatpush1.bf16.msra.mxu1 %v590_v16  ;;  %166 = vmatprep.subr.bf16.mxu0 %v452_v0 }
  0x30   :  { %222 = vmatprep.subr.bf16.mxu1 %v452_v0 }
  0x32   :  { %167 = vmatpush1.bf16.msra.mxu0 %v599_v17 }
  0x33   :  { %223 = vmatpush1.bf16.msra.mxu1 %v599_v17  ;;  %168 = vmatprep.subr.bf16.mxu0 %v452_v0 }
  0x34   :  { %224 = vmatprep.subr.bf16.mxu1 %v452_v0 }
  0x36   :  { %169 = vmatpush1.bf16.msra.mxu0 %v610_v19 }
  0x37   :  { %225 = vmatpush1.bf16.msra.mxu1 %v610_v19  ;;  %256 = vmatprep.subr.bf16.mxu0 %v452_v0 }
  0x38   :  { %312 = vmatprep.subr.bf16.mxu1 %v452_v0 }
  0x39   :  { %175 = vmatmul.mubr.bf16.vlgmr.msra.gmra.mrb[0].mxu0 %v440_v20 }
  0x3a   :  { %231 = vmatmul.mubr.bf16.vlgmr.msra.gmra.mrb[0].mxu1 %v443_v21  ;;  %257 = vmatpush1.bf16.msra.mxu0 %v478_v1 }
  0x3b   :  { %313 = vmatpush1.bf16.msra.mxu1 %v478_v1  ;;  %258 = vmatprep.subr.bf16.mxu0 %v452_v0 }
  0x3c   :  { %314 = vmatprep.subr.bf16.mxu1 %v452_v0  ;;  %414 = vmatprep.mubr.msk.bf16.mxu0 %vm134_vm0, %v446_v22 }
  0x3d   :  { %419 = vmatprep.mubr.msk.bf16.mxu1 %vm134_vm0, %v448_v23 }
  0x3e   :  { %259 = vmatpush1.bf16.msra.mxu0 %v486_v2 }
  0x3f   :  { %315 = vmatpush1.bf16.msra.mxu1 %v486_v2  ;;  %260 = vmatprep.subr.bf16.mxu0 %v452_v0 }
  0x40   :  { %316 = vmatprep.subr.bf16.mxu1 %v452_v0 }
  0x42   :  { %261 = vmatpush1.bf16.msra.mxu0 %v495_v3 }
  0x43   :  { %317 = vmatpush1.bf16.msra.mxu1 %v495_v3  ;;  %262 = vmatprep.subr.bf16.mxu0 %v452_v0 }
  0x44   :  { %318 = vmatprep.subr.bf16.mxu1 %v452_v0 }
  0x46   :  { %263 = vmatpush1.bf16.msra.mxu0 %v504_v4 }
  0x47   :  { %319 = vmatpush1.bf16.msra.mxu1 %v504_v4  ;;  %264 = vmatprep.subr.bf16.mxu0 %v452_v0 }
  0x48   :  { %320 = vmatprep.subr.bf16.mxu1 %v452_v0 }
  0x4a   :  { %265 = vmatpush1.bf16.msra.mxu0 %v513_v5 }
  0x4b   :  { %321 = vmatpush1.bf16.msra.mxu1 %v513_v5  ;;  %266 = vmatprep.subr.bf16.mxu0 %v452_v0 }
  0x4c   :  { %322 = vmatprep.subr.bf16.mxu1 %v452_v0 }
  0x4e   :  { %267 = vmatpush1.bf16.msra.mxu0 %v529_v8 }
  0x4f   :  { %323 = vmatpush1.bf16.msra.mxu1 %v529_v8  ;;  %268 = vmatprep.subr.bf16.mxu0 %v452_v0 }
  0x50   :  { %324 = vmatprep.subr.bf16.mxu1 %v452_v0 }
  0x52   :  { %269 = vmatpush1.bf16.msra.mxu0 %v545_v11 }
  0x53   :  { %325 = vmatpush1.bf16.msra.mxu1 %v545_v11  ;;  %270 = vmatprep.subr.bf16.mxu0 %v452_v0 }
  0x54   :  { %326 = vmatprep.subr.bf16.mxu1 %v452_v0 }
  0x56   :  { %271 = vmatpush1.bf16.msra.mxu0 %v554_v12 }
  0x57   :  { %327 = vmatpush1.bf16.msra.mxu1 %v554_v12  ;;  %272 = vmatprep.subr.bf16.mxu0 %v452_v0 }
  0x58   :  { %328 = vmatprep.subr.bf16.mxu1 %v452_v0 }
  0x5a   :  { %273 = vmatpush1.bf16.msra.mxu0 %v563_v13 }
  0x5b   :  { %329 = vmatpush1.bf16.msra.mxu1 %v563_v13  ;;  %274 = vmatprep.subr.bf16.mxu0 %v452_v0 }
  0x5c   :  { %330 = vmatprep.subr.bf16.mxu1 %v452_v0 }
  0x5e   :  { %275 = vmatpush1.bf16.msra.mxu0 %v572_v14 }
  0x5f   :  { %331 = vmatpush1.bf16.msra.mxu1 %v572_v14  ;;  %276 = vmatprep.subr.bf16.mxu0 %v452_v0 }
  0x60   :  { %332 = vmatprep.subr.bf16.mxu1 %v452_v0 }
  0x62   :  { %277 = vmatpush1.bf16.msra.mxu0 %v581_v15 }
  0x63   :  { %333 = vmatpush1.bf16.msra.mxu1 %v581_v15  ;;  %278 = vmatprep.subr.bf16.mxu0 %v452_v0 }
  0x64   :  { %334 = vmatprep.subr.bf16.mxu1 %v452_v0 }
  0x66   :  { %279 = vmatpush1.bf16.msra.mxu0 %v590_v16 }
  0x67   :  { %335 = vmatpush1.bf16.msra.mxu1 %v590_v16  ;;  %280 = vmatprep.subr.bf16.mxu0 %v452_v0 }
  0x68   :  { %336 = vmatprep.subr.bf16.mxu1 %v452_v0 }
  0x6a   :  { %281 = vmatpush1.bf16.msra.mxu0 %v599_v17 }
  0x6b   :  { %337 = vmatpush1.bf16.msra.mxu1 %v599_v17  ;;  %282 = vmatprep.subr.bf16.mxu0 %v452_v0 }
  0x6c   :  { %338 = vmatprep.subr.bf16.mxu1 %v452_v0 }
  0x6e   :  { %283 = vmatpush1.bf16.msra.mxu0 %v610_v19 }
  0x6f   :  { %339 = vmatpush1.bf16.msra.mxu1 %v610_v19 }
  0x71   :  { %289 = vmatmul.mubr.bf16.vlgmr.msra.gmra.mrb[4].mxu0 %v450_v24 }
  0x72   :  { %345 = vmatmul.mubr.bf16.vlgmr.msra.gmra.mrb[4].mxu1 %v451_v25 }
  0x84   :  { %v362_v36 = vpop.permute.xlu0 %361 }
  0x88   :  { %v367_v50 = vpop.permute.xlu0 %366 }
 0x10c   :  { %v176_v26 = vpop.f32.mrb[0].mxu0 }
 0x10d   :  { %v232_v27 = vpop.f32.mrb[0].mxu1  ;;  %v178_v29 = vpop.f32.mrb[1].mxu0 }
 0x10e   :  { %v239_v28 = vmax.f32 %v176_v26, %v232_v27  ;;  %v234_v30 = vpop.f32.mrb[1].mxu1  ;;  %v179_v31 = vpop.f32.mrb[2].mxu0 }
 0x10f   :  { %v235_v32 = vpop.f32.mrb[2].mxu1  ;;  %v181_v34 = vpop.f32.mrb[3].mxu0 }
 0x110   :  { %v240_v33 = vmax.f32 %v179_v31, %v235_v32  ;;  %v237_v35 = vpop.f32.mrb[3].mxu1 }
 0x144   :  { %v290_v37 = vpop.f32.mrb[4].mxu0 }
 0x145   :  { %v346_v38 = vpop.f32.mrb[4].mxu1  ;;  %v292_v40 = vpop.f32.mrb[5].mxu0 }
 0x146   :  { %v353_v39 = vmax.f32 %v290_v37, %v346_v38  ;;  %v348_v41 = vpop.f32.mrb[5].mxu1  ;;  %v293_v42 = vpop.f32.mrb[6].mxu0 }
 0x147   :  { %v349_v43 = vpop.f32.mrb[6].mxu1  ;;  %v295_v46 = vpop.f32.mrb[7].mxu0 }
 0x148   :  { %v355_v44 = vmax.f32 %v239_v28, %v353_v39  ;;  %v354_v45 = vmax.f32 %v293_v42, %v349_v43  ;;  %v351_v47 = vpop.f32.mrb[7].mxu1 }
 0x14a   :  { %v369_v48 = vadd.f32 %v362_v36, %v355_v44  ;;  %v356_v49 = vmax.f32 %v240_v33, %v354_v45 }
 0x14c   :  { %v371_v51 = vmax.f32 %v369_v48, 0.0  ;;  %v370_v52 = vadd.f32 %v367_v50, %v356_v49 }
 0x14e   :  { %v422_v53 = vpack.c.bf16 %v371_v51, %v371_v51  ;;  %v372_v54 = vmax.f32 %v370_v52, 0.0 }
 0x150   :  { %382 = vst.msk [vmem:[%s699_s3] sm:$0xf] %vm381_vm2, %v422_v53  ;;  %v423_v55 = vpack.c.bf16 %v372_v54, %v372_v54 }
 0x152   :  { %383 = vst.msk [vmem:[%s699_s3 + $0x4] sm:$0xf] %vm381_vm2, %v423_v55 }

// kernel: net_forward.5
= control target key start
LH: loop header
LB: loop body
LE: loop exit
PB: predicated region body
PF: predicated region fallthrough
CT: control target
= control target key end

     0   :  { %v770_v1 = vmov 0   ;;  %v98_v20 = vlaneseq  ;;  %v771_v25 = vmov 1966171168   ;;  %vm264_vm0 = vcmask 130048   ;;  %s981_s0 = inlined_call_operand.vmem [shape: bf16[2,400], index: 0, kind: input, shape index: {}]   ;;  %s982_s1 = inlined_call_operand.vmem [shape: bf16[400,120], index: 1, kind: input, shape index: {}]   ;;  %s983_s2 = inlined_call_operand.vmem [shape: f32[1,120], index: 2, kind: input, shape index: {}]   ;;  %s984_s3 = inlined_call_operand.vmem [shape: bf16[120,84], index: 3, kind: input, shape index: {}]   ;;  %s985_s4 = inlined_call_operand.vmem [shape: f32[1,84], index: 4, kind: input, shape index: {}]   ;;  %s986_s5 = inlined_call_operand.vmem [shape: bf16[84,10], index: 5, kind: input, shape index: {}]   ;;  %s987_s6 = inlined_call_operand.vmem [shape: f32[1,10], index: 6, kind: input, shape index: {}]   ;;  %s988_s7 = inlined_call_operand.hbm [shape: f32[2,10], index: 7, kind: output, shape index: {}]  }
   0x1   :  { %v707_v0 = vld [vmem:[%s982_s1 + $0x40] sm:$0xff]   ;;  %308 = vmatprep.subr.bf16.mxu1 %v770_v1  ;;  %v710_v4 = vld [vmem:[%s982_s1 + $0x48] sm:$0xff]   ;;  %v713_v7 = vld [vmem:[%s982_s1 + $0x50] sm:$0xff]   ;;  %v96_v26 = vunpack.c.l.s4 %v771_v25  ;;  %v772_v38 = vmov 0.0  }
   0x2   :  { %v708_v2 = vld [vmem:[%s982_s1 + $0x80] sm:$0xff]   ;;  %628 = vmatprep.subr.bf16.mxu0 %v707_v0  ;;  %v711_v5 = vld [vmem:[%s982_s1 + $0x88] sm:$0xff]   ;;  %v714_v8 = vld [vmem:[%s982_s1 + $0x90] sm:$0xff]   ;;  %v99_v27 = vshrl.u32 %v98_v20, 7 }
   0x3   :  { %v709_v3 = vld [vmem:[%s982_s1] sm:$0xff]   ;;  %309 = vmatpush1.bf16.msra.mxu1 %v708_v2  ;;  %v712_v6 = vld [vmem:[%s982_s1 + $0x8] sm:$0xff]   ;;  %v715_v9 = vld [vmem:[%s982_s1 + $0x10] sm:$0xff]   ;;  %v97_v30 = vunpack.c.0.s8 %v96_v26 }
   0x4   :  { %629 = vmatpush3.bf16.msra.mxu0 %v709_v3  ;;  %310 = vmatprep.subr.bf16.mxu1 %v770_v1  ;;  %v716_v10 = vld [vmem:[%s982_s1 + $0x58] sm:$0xff]   ;;  %v719_v13 = vld [vmem:[%s982_s1 + $0x60] sm:$0xff]   ;;  %v722_v16 = vld [vmem:[%s982_s1 + $0x68] sm:$0xff]  }
   0x5   :  { %630 = vmatprep.subr.bf16.mxu0 %v710_v4  ;;  %v717_v11 = vld [vmem:[%s982_s1 + $0x98] sm:$0xff]   ;;  %v720_v14 = vld [vmem:[%s982_s1 + $0xa0] sm:$0xff]   ;;  %v723_v17 = vld [vmem:[%s982_s1 + $0xa8] sm:$0xff]   ;;  %v100_v32 = vsub.s32 %v97_v30, %v99_v27 }
   0x6   :  { %v718_v12 = vld [vmem:[%s982_s1 + $0x18] sm:$0xff]   ;;  %v721_v15 = vld [vmem:[%s982_s1 + $0x20] sm:$0xff]   ;;  %v724_v18 = vld [vmem:[%s982_s1 + $0x28] sm:$0xff]  }
   0x7   :  { %311 = vmatpush1.bf16.msra.mxu1 %v711_v5  ;;  %v725_v19 = vld [vmem:[%s982_s1 + $0x70] sm:$0xff]   ;;  %v583_v23 = vld.sshfl [vmem:[%s981_s0] sm:$0x33 pattern:$0x75316420]  ;;  %v728_v24 = vld [vmem:[%s982_s1 + $0x78] sm:$0xff]  }
   0x8   :  { %631 = vmatpush3.bf16.msra.mxu0 %v712_v6  ;;  %312 = vmatprep.subr.bf16.mxu1 %v770_v1  ;;  %v726_v21 = vld [vmem:[%s982_s1 + $0xb0] sm:$0xff]   ;;  %v729_v28 = vld [vmem:[%s982_s1 + $0xb8] sm:$0xff]   ;;  %v94_v29 = vcombine.high %v583_v23, %v583_v23  ;;  %v731_v33 = vld [vmem:[%s982_s1 + $0xc0] sm:$0xff]   ;;  %v101_v36 = vrot.slane %v583_v23, %v100_v32 }
   0x9   :  { %632 = vmatprep.subr.bf16.mxu0 %v713_v7  ;;  %v727_v22 = vld [vmem:[%s982_s1 + $0x30] sm:$0xff]   ;;  %v730_v31 = vld [vmem:[%s982_s1 + $0x38] sm:$0xff]   ;;  %v732_v34 = vld [vmem:[%s984_s3] sm:$0xff]  }
   0xa   :  { %v108_v35 = vrot.slane %v94_v29, %v100_v32  ;;  %v109_v39 = vcombine.high %v101_v36, %v101_v36  ;;  %v733_v40 = vld [vmem:[%s984_s3 + $0x8] sm:$0xff]  }
   0xb   :  { %313 = vmatpush1.bf16.msra.mxu1 %v714_v8 }
   0xc   :  { %633 = vmatpush3.bf16.msra.mxu0 %v715_v9  ;;  %314 = vmatprep.subr.bf16.mxu1 %v770_v1  ;;  %v110_v37 = vcombine.high %v108_v35, %v108_v35 }
   0xd   :  { %634 = vmatprep.subr.bf16.mxu0 %v716_v10  ;;  %300 = vmatprep.mubr.bf16.mxu0 %v108_v35 }
   0xe   :  { %609 = vmatprep.mubr.msk.bf16.mxu1 %vm264_vm0, %v110_v37 }
   0xf   :  { %315 = vmatpush1.bf16.msra.mxu1 %v717_v11 }
  0x10   :  { %635 = vmatpush3.bf16.msra.mxu0 %v718_v12  ;;  %316 = vmatprep.subr.bf16.mxu1 %v770_v1 }
  0x11   :  { %636 = vmatprep.subr.bf16.mxu0 %v719_v13 }
  0x13   :  { %317 = vmatpush1.bf16.msra.mxu1 %v720_v14 }
  0x14   :  { %637 = vmatpush3.bf16.msra.mxu0 %v721_v15  ;;  %318 = vmatprep.subr.bf16.mxu1 %v770_v1 }
  0x15   :  { %638 = vmatprep.subr.bf16.mxu0 %v722_v16 }
  0x17   :  { %319 = vmatpush1.bf16.msra.mxu1 %v723_v17 }
  0x18   :  { %639 = vmatpush3.bf16.msra.mxu0 %v724_v18  ;;  %320 = vmatprep.subr.bf16.mxu1 %v770_v1 }
  0x19   :  { %640 = vmatprep.subr.bf16.mxu0 %v725_v19 }
  0x1b   :  { %321 = vmatpush1.bf16.msra.mxu1 %v726_v21 }
  0x1c   :  { %641 = vmatpush3.bf16.msra.mxu0 %v727_v22  ;;  %322 = vmatprep.subr.bf16.mxu1 %v770_v1 }
  0x1d   :  { %642 = vmatprep.subr.bf16.mxu0 %v728_v24 }
  0x1f   :  { %323 = vmatpush1.bf16.msra.mxu1 %v729_v28 }
  0x20   :  { %643 = vmatpush3.bf16.msra.mxu0 %v730_v31  ;;  %324 = vmatprep.subr.bf16.mxu1 %v770_v1 }
  0x21   :  { %666 = vmatprep.subr.bf16.mxu0 %v772_v38 }
  0x23   :  { %301 = vmatmul.mubr.bf16.vlgmr.msra.gmra.mrb[0].mxu0 %v101_v36  ;;  %325 = vmatpush1.bf16.msra.mxu1 %v731_v33 }
  0x24   :  { %667 = vmatpush3.bf16.msra.mxu0 %v732_v34 }
  0x25   :  { %12 = vsyncpa [#allocation3], 0  ;;  %668 = vmatprep.subr.bf16.mxu0 %v772_v38  ;;  %686 = vmatprep.subr.bf16.mxu1 %v772_v38  ;;  %v734_v41 = vld [vmem:[%s984_s3 + $0x10] sm:$0xff]   ;;  %v735_v42 = vld [vmem:[%s984_s3 + $0x18] sm:$0xff]   ;;  %vm421_vm1 = vcmask 1043456   ;;  %vm773_vm2 = vmmov 0  }
  0x26   :  { %341 = vmatmul.mubr.bf16.vlgmr.msra.gmra.mrb[0].mxu1 %v109_v39  ;;  %v736_v43 = vld [vmem:[%s984_s3 + $0x20] sm:$0xff]   ;;  %v737_v44 = vld [vmem:[%s984_s3 + $0x28] sm:$0xff]   ;;  %v738_v45 = vld [vmem:[%s984_s3 + $0x30] sm:$0xff]   ;;  %682 = vmatprep.mubr.msk.bf16.mxu0 %vm773_vm2, %v772_v38  ;;  %vm417_vm3 = vcmask 982016   ;;  %vm522_vm4 = vcmask 1041408   ;;  %vm518_vm5 = vcmask 687104  }
  0x27   :  { %v739_v46 = vld [vmem:[%s984_s3 + $0x38] ss:$0 sps:$4 sm:$0xff]   ;;  %698 = vmatprep.mubr.msk.bf16.mxu1 %vm773_vm2, %v772_v38  ;;  %v740_v48 = vld [vmem:[%s986_s5] sm:$0xff]   ;;  %v741_v49 = vld [vmem:[%s986_s5 + $0x8] sm:$0xff]   ;;  %vm566_vm6 = vcmask 74752  }
  0x28   :  { %669 = vmatpush3.bf16.msra.mxu0 %v733_v40  ;;  %v423_v47 = vsel %vm421_vm1, %v739_v46, 0  ;;  %687 = vmatpush3.bf16.msra.mxu1 %v740_v48  ;;  %v742_v50 = vld [vmem:[%s986_s5 + $0x10] sm:$0xff]   ;;  %v743_v51 = vld [vmem:[%s986_s5 + $0x18] sm:$0xff]   ;;  %v582_v54 = vld [vmem:[%s983_s2] ss:$0 sm:$0xff] }
  0x29   :  { %670 = vmatprep.subr.bf16.mxu0 %v772_v38  ;;  %688 = vmatprep.subr.bf16.mxu1 %v772_v38  ;;  %v744_v2 = vld [vmem:[%s986_s5 + $0x20] sm:$0xff]   ;;  %v745_v3 = vld [vmem:[%s986_s5 + $0x28] ss:$0 sps:$4 sm:$0x33]   ;;  %s774_s5 = smov [#allocation2]  }
  0x2a   :  { %v524_v4 = vsel %vm522_vm4, %v745_v3, 0  ;;  %v610_v5 = vld [vmem:[%s985_s4] ss:$0 sm:$0xff]  ;;  %s574_s12 = sshll.u32 %s774_s5, 4  ;;  %s575_s12 = int_to_ptr.vmem [resolvable:$true] %s574_s12 }
  0x2b   :  { %v620_v13 = vld [vmem:[%s987_s6] ss:$0 sm:$0xff]  ;;  %s746_s4 = scalar_lea.vmem %s575_s12, 32  ;;  %p751_p1 = scmp.lt.s32.totalorder %s575_s12, %s575_s12 }
  0x2c   :  { %671 = vmatpush3.bf16.msra.mxu0 %v734_v41  ;;  %689 = vmatpush3.bf16.msra.mxu1 %v741_v49  ;;  %p747_p0 = scmp.ne.s32.totalorder %s575_s12, %s746_s4  ;;  %p752_p2 = scmp.lt.s32.totalorder %s746_s4, %s746_s4 }
  0x2d   :  { %672 = vmatprep.subr.bf16.mxu0 %v772_v38  ;;  %690 = vmatprep.subr.bf16.mxu1 %v772_v38 }
  0x2e   :  { %p753_p3 = por %p752_p2, %p751_p1 }
  0x30   :  { %673 = vmatpush3.bf16.msra.mxu0 %v735_v42  ;;  %691 = vmatpush3.bf16.msra.mxu1 %v742_v50  ;;  %p754_p4 = pnand %p753_p3, %p747_p0 }
  0x31   :  { %674 = vmatprep.subr.bf16.mxu0 %v772_v38  ;;  %692 = vmatprep.subr.bf16.mxu1 %v772_v38 }
  0x34   :  { %675 = vmatpush3.bf16.msra.mxu0 %v736_v43  ;;  %693 = vmatpush3.bf16.msra.mxu1 %v743_v51 }
  0x35   :  { %676 = vmatprep.subr.bf16.mxu0 %v772_v38  ;;  %694 = vmatprep.subr.bf16.mxu1 %v772_v38 }
  0x38   :  { %677 = vmatpush3.bf16.msra.mxu0 %v737_v44  ;;  %695 = vmatpush3.bf16.msra.mxu1 %v744_v2 }
  0x39   :  { %678 = vmatprep.subr.bf16.mxu0 %v772_v38  ;;  %696 = vmatprep.subr.bf16.mxu1 %v772_v38 }
  0x3c   :  { %679 = vmatpush3.bf16.msra.mxu0 %v738_v45  ;;  %697 = vmatpush3.bf16.msra.mxu1 %v524_v4 }
  0x3d   :  { %680 = vmatprep.subr.bf16.mxu0 %v772_v38 }
  0x40   :  { %681 = vmatpush3.bf16.msra.mxu0 %v423_v47 }
  0xf6   :  { %v644_v52 = vpop.f32.mrb[0].mxu0 }
  0xf7   :  { %v645_v53 = vpop.f32.mrb[1].mxu0 }
  0xf8   :  { %v646_v55 = vadd.f32 %v645_v53, %v644_v52  ;;  %v647_v56 = vpop.f32.mrb[2].mxu0 }
  0xf9   :  { %v648_v57 = vpop.f32.mrb[3].mxu0  ;;  %v342_v58 = vpop.f32.mrb[0].mxu1 }
  0xfa   :  { %v303_v59 = vadd.f32 %v646_v55, %v582_v54  ;;  %v344_v60 = vpop.f32.mrb[1].mxu1 }
  0xfb   :  { %v345_v61 = vpop.f32.mrb[2].mxu1 }
  0xfc   :  { %v343_v62 = vadd.f32 %v342_v58, %v303_v59  ;;  %v346_v63 = vpop.f32.mrb[3].mxu1 }
  0xfe   :  { %v348_v0 = vmax.f32 %v343_v62, 0.0 }
 0x100   :  { %v349_v1 = vpack.c.bf16 %v348_v0, %v348_v0 }
 0x102   :  { %683 = vmatmul.mubr.msk.bf16.vlgmr.msra.gmra.mrb[4].mxu0 %vm417_vm3, %v349_v1 }
 0x1d5   :  { %v459_v6 = vpop.f32.mrb[4].mxu0 }
 0x1d6   :  { %v460_v7 = vadd.f32 %v610_v5, %v459_v6  ;;  %v684_v8 = vpop.f32.mrb[5].mxu0 }
 0x1d7   :  { %v462_v9 = vpop.f32.mrb[6].mxu0 }
 0x1d8   :  { %v465_v10 = vmax.f32 %v460_v7, 0.0  ;;  %v685_v11 = vpop.f32.mrb[7].mxu0 }
 0x1da   :  { %v466_v12 = vpack.c.bf16 %v465_v10, %v465_v10 }
 0x1dc   :  { %699 = vmatmul.mubr.msk.bf16.vlgmr.msra.gmra.mrb[4].mxu1 %vm518_vm5, %v466_v12 }
 0x2af   :  { %v560_v14 = vpop.f32.mrb[4].mxu1 }
 0x2b0   :  { %v561_v15 = vadd.f32 %v620_v13, %v560_v14  ;;  %v700_v16 = vpop.f32.mrb[5].mxu1 }
 0x2b1   :  { %v563_v17 = vpop.f32.mrb[6].mxu1 }
 0x2b2   :  { %v701_v18 = vpop.f32.mrb[7].mxu1  ;;  %567 = vst.msk [vmem:[#allocation2] sm:$0x3] %vm566_vm6, %v561_v15 }
 0x2b3   :  { %757 = shalt.err (!%p754_p4)
}
 0x2b4   :  { %s758_s6 = scalar_lea.hbm %s988_s7, 32 }
 0x2b5   :  { %p759_p5 = scmp.ne.s32.totalorder %s988_s7, %s758_s6  ;;  %p762_p6 = scmp.lt.u32.totalorder %s758_s6, %s988_s7 }
 0x2b7   :  { %p764_p7 = pnand %p762_p6, %p759_p5 }
 0x2b9   :  { %767 = shalt.err (!%p764_p7)
}
 0x2ba   :  { %577 = dma.vmem_to_hbm [thread:$0]  %s575_s12, 32, %s988_s7, [#allocation3]  }
 0x2bb   :  { %768 = dma.done.wait [#allocation3], 32  }
 0x2bc   :  { %769 = vsyncadd [#allocation3], 4294967264 }
 0x2bd   :  { %581 = vsyncpa [#allocation3], 1 }

</bundles_post_ra>
